<compile_context>
chip_gen: v7x
topology: tpu7x:2x2x1
jax: 0.10.0
libtpu: 0.0.40
codegen_flags: <defaults>
</compile_context>

<pallas_src>
import functools
from math import sqrt

import jax
import jax.numpy as jnp
from jax.experimental import pallas as pl
from jax.experimental.pallas import tpu as pltpu


def _round_up(n, m):
    return ((n + m - 1) // m) * m


def _mlp_softmax_kernel(x_ref, w1_ref, b1_ref, w2_ref, b2_ref, o_ref, *, d_out):
    # x_ref:  (TB, D_in)      VMEM f32 (cast to bf16 on the VPU below; hides under MXU)
    # w1_ref: (D_in, H_p)     VMEM bf16, resident across grid steps
    # b1_ref: (1, H_p)        VMEM f32,  resident (zero-padded)
    # w2_ref: (H_p, D_out_p)  VMEM bf16, resident (zero-padded rows)
    # b2_ref: (1, D_out_p)    VMEM f32,  resident (-1e30 on padded columns)
    # o_ref:  (TB, d_out)     VMEM f32
    x = x_ref[...].astype(w1_ref.dtype)

    # layer1 + ReLU : bf16 operands on the MXU, f32 accumulate, f32 epilogue
    h = jnp.dot(x, w1_ref[...], preferred_element_type=jnp.float32) + b1_ref[...]
    h = jnp.maximum(h, 0.0)

    # layer2 : activations back to bf16 for the MXU, f32 accumulate
    logits = jnp.dot(h.astype(w2_ref.dtype), w2_ref[...],
                     preferred_element_type=jnp.float32) + b2_ref[...]

    # softmax over the last axis (PyTorch nn.Softmax, dim=1 for 2-D input).
    # Padded logit columns carry a -1e30 bias -> exp() underflows to exactly 0.
    m = jnp.max(logits, axis=-1, keepdims=True)
    e = jnp.exp(logits - m)
    denom = jnp.sum(e, axis=-1, keepdims=True)
    r = pl.reciprocal(denom, approx=True)   # EUP slot (otherwise idle here)
    r = r * (2.0 - denom * r)               # one Newton step -> ~f32 accuracy
    # lane-slice to the real output width; masked store (cheap for small D_out)
    o_ref[...] = (e * r)[:, :d_out].astype(o_ref.dtype)


def _forward_pallas(x, w1_p, b1_p, w2_p, b2_p, d_out, tb, use_buffered):
    B, D_in = x.shape
    H_p = w1_p.shape[1]
    D_out_p = w2_p.shape[1]

    # pinned (weight/bias) operands: single-buffered when supported
    resident_kw = dict(pipeline_mode=pl.Buffered(1)) if use_buffered else {}
    buf_cnt = 1 if use_buffered else 2

    # explicit VMEM budget -> vmem_limit_bytes (default scoped limit is only
    # 16 MiB on v5e / 32 MiB on v6e & v7x)
    resident_bytes = buf_cnt * ((D_in * H_p + H_p * D_out_p) * 2 + (H_p + D_out_p) * 4)
    stream_bytes = 2 * tb * (D_in + d_out) * 4          # double-buffered x / out tiles
    scratch_bytes = tb * (H_p + 2 * D_out_p) * 4        # h / logits / probs live values
    vmem_limit = min(max(2 * (resident_bytes + stream_bytes + scratch_bytes),
                         16 << 20), 64 << 20)

    cost = pl.CostEstimate(
        flops=2 * B * (D_in * H_p + H_p * D_out_p),
        transcendentals=B * (D_out_p + 1),
        bytes_accessed=(B * D_in * 4 + B * d_out * 4
                        + (D_in * H_p + H_p * D_out_p) * 2 + (H_p + D_out_p) * 4),
    )

    return pl.pallas_call(
        functools.partial(_mlp_softmax_kernel, d_out=d_out),
        out_shape=jax.ShapeDtypeStruct((B, d_out), jnp.float32),
        grid=(pl.cdiv(B, tb),),
        in_specs=[
            # batch-tiled activation: new tile per grid step (double-buffered DMA)
            pl.BlockSpec((tb, D_in), lambda i: (i, 0)),
            # weights / biases: pinned to block (0, 0) -> VMEM resident
            pl.BlockSpec((D_in, H_p), lambda i: (0, 0), **resident_kw),
            pl.BlockSpec((1, H_p), lambda i: (0, 0), **resident_kw),
            pl.BlockSpec((H_p, D_out_p), lambda i: (0, 0), **resident_kw),
            pl.BlockSpec((1, D_out_p), lambda i: (0, 0), **resident_kw),
        ],
        out_specs=pl.BlockSpec((tb, d_out), lambda i: (i, 0)),
        compiler_params=pltpu.CompilerParams(
            # batch tiles are independent -> shard across TensorCores on v7x
            dimension_semantics=("parallel",),
            vmem_limit_bytes=vmem_limit),
        cost_estimate=cost,
    )(x, w1_p, b1_p, w2_p, b2_p)


def multi_model_forward(x, w1_t, b1, w2_t, b2, *, block_b=1024):
    """x: (B, D_in) f32; w1_t: (D_in, H); b1: (H,); w2_t: (H, D_out); b2: (D_out,).

    Not wrapped in jax.jit here so the Buffered(1) probe below can catch a
    lowering rejection eagerly and fall back; wrap the whole thing in jit in
    production once the probe path is known-good for your JAX build.
    """
    x = jnp.asarray(x, jnp.float32)
    B, D_in = x.shape
    H = w1_t.shape[1]
    D_out = w2_t.shape[1]

    # --- static layout plumbing on the (small, reused) weights only ---
    H_p = _round_up(H, 128)          # lane-dense hidden activations
    D_out_p = _round_up(D_out, 128)  # lane-dense logits for matmul-2 / softmax

    w1_p = (jnp.zeros((D_in, H_p), jnp.bfloat16)
            .at[:, :H].set(w1_t.astype(jnp.bfloat16)))
    b1_p = jnp.zeros((1, H_p), jnp.float32).at[0, :H].set(b1.astype(jnp.float32))
    w2_p = (jnp.zeros((H_p, D_out_p), jnp.bfloat16)
            .at[:H, :D_out].set(w2_t.astype(jnp.bfloat16)))
    # padded logit columns get a huge negative bias so softmax assigns them exactly 0
    b2_p = (jnp.full((1, D_out_p), -1e30, jnp.float32)
            .at[0, :D_out].set(b2.astype(jnp.float32)))

    # --- batch tiling (f32 x -> 8-row sublane granularity) ---
    TB = min(block_b, _round_up(B, 8))
    if B > 256:                       # v7x: keep >= 2 grid steps so both TCs get work
        TB = min(TB, _round_up((B + 1) // 2, 8))

    # VMEM budget guard (v7x: 64 MiB physical / ~32 MiB scoped default)
    def _need(tb):
        return (2 * ((D_in * H_p + H_p * D_out_p) * 2 + (H_p + D_out_p) * 4)
                + 2 * tb * (D_in + D_out) * 4 + tb * (H_p + 2 * D_out_p) * 4)
    while TB > 8 and _need(TB) > (28 << 20):
        TB = max(8, _round_up(TB // 2, 8))

    try:
        return _forward_pallas(x, w1_p, b1_p, w2_p, b2_p, D_out, TB, use_buffered=True)
    except Exception:
        # pl.Buffered(1) on pinned operands not supported by this JAX build:
        # identical math with default double-buffered resident specs.
        return _forward_pallas(x, w1_p, b1_p, w2_p, b2_p, D_out, TB, use_buffered=False)


def init_params(key, input_size, output_size):
    """Deterministic PyTorch-style init: U(-1/sqrt(fan_in), 1/sqrt(fan_in))."""
    hidden_size = max(input_size, output_size) * 2
    k1, k2, k3, k4 = jax.random.split(key, 4)
    bound1 = 1.0 / sqrt(input_size)
    bound2 = 1.0 / sqrt(hidden_size)
    # Stored already transposed: (in, out)
    w1_t = jax.random.uniform(k1, (input_size, hidden_size), jnp.float32,
                              -bound1, bound1)
    b1 = jax.random.uniform(k2, (hidden_size,), jnp.float32, -bound1, bound1)
    w2_t = jax.random.uniform(k3, (hidden_size, output_size), jnp.float32,
                              -bound2, bound2)
    b2 = jax.random.uniform(k4, (output_size,), jnp.float32, -bound2, bound2)
    return w1_t, b1, w2_t, b2


if __name__ == "__main__":
    key = jax.random.PRNGKey(0)
    input_size, output_size = 16, 4
    batch = 8

    kx, kp = jax.random.split(key)
    x = jax.random.normal(kx, (batch, input_size), jnp.float32)
    w1_t, b1, w2_t, b2 = init_params(kp, input_size, output_size)

    out = multi_model_forward(x, w1_t, b1, w2_t, b2)
    jax.block_until_ready(out)

    # Reference with the same bf16 operand casts (f32 accumulation) as the kernel's
    # MXU path, so the comparison stays tight even though the MXU runs bf16.
    xb = x.astype(jnp.bfloat16)
    w1b = w1_t.astype(jnp.bfloat16)
    w2b = w2_t.astype(jnp.bfloat16)
    ref_h = jnp.maximum(
        jnp.dot(xb, w1b, preferred_element_type=jnp.float32) + b1, 0.0)
    ref = jax.nn.softmax(
        jnp.dot(ref_h.astype(jnp.bfloat16), w2b,
                preferred_element_type=jnp.float32) + b2, axis=-1)

    assert out.shape == (batch, output_size)
    assert bool(jnp.allclose(jnp.sum(out, axis=-1), 1.0, atol=1e-4))
    assert bool(jnp.allclose(out, ref, atol=1e-4))

    print("KERNEL_OK")
</pallas_src>

<mosaic_0001>
module attributes {stable_mosaic.version = 11 : i64} {
  func.func @_mlp_softmax_kernel(%arg0: i32, %arg1: memref<8x16xf32, #tpu.memory_space<vmem>>, %arg2: memref<16x128xbf16, #tpu.memory_space<vmem>>, %arg3: memref<1x128xf32, #tpu.memory_space<vmem>>, %arg4: memref<128x128xbf16, #tpu.memory_space<vmem>>, %arg5: memref<1x128xf32, #tpu.memory_space<vmem>>, %arg6: memref<8x4xf32, #tpu.memory_space<vmem>>) attributes {dimension_semantics = [#tpu.dimension_semantics<parallel>], iteration_bounds = array<i64: 1>, scalar_prefetch = 0 : i64, scratch_operands = 0 : i64, tpu.core_type = #tpu.core_type<tc>, window_params = [{transform_indices = @transform_0, window_bounds = array<i64: 8, 16>}, {pipeline_mode = #tpu.pipeline_mode<synchronous>, transform_indices = @transform_1, window_bounds = array<i64: 16, 128>}, {pipeline_mode = #tpu.pipeline_mode<synchronous>, transform_indices = @transform_2, window_bounds = array<i64: 1, 128>}, {pipeline_mode = #tpu.pipeline_mode<synchronous>, transform_indices = @transform_3, window_bounds = array<i64: 128, 128>}, {pipeline_mode = #tpu.pipeline_mode<synchronous>, transform_indices = @transform_4, window_bounds = array<i64: 1, 128>}, {transform_indices = @transform_5, window_bounds = array<i64: 8, 4>}]} {
    %c0 = arith.constant 0 : index
    %c0_0 = arith.constant 0 : index
    %0 = vector.load %arg1[%c0, %c0_0] : memref<8x16xf32, #tpu.memory_space<vmem>>, vector<8x16xf32>
    %1 = arith.truncf %0 : vector<8x16xf32> to vector<8x16xbf16>
    %c0_1 = arith.constant 0 : index
    %c0_2 = arith.constant 0 : index
    %2 = vector.load %arg2[%c0_1, %c0_2] : memref<16x128xbf16, #tpu.memory_space<vmem>>, vector<16x128xbf16>
    %cst = arith.constant dense<0.000000e+00> : vector<8x128xf32>
    %3 = tpu.matmul %1, %2, %cst {dimension_numbers = #tpu.dot_dimension_numbers<[1], [0], [0], [1], [0, 0, 1, 1], [], []>} : vector<8x16xbf16>, vector<16x128xbf16>, vector<8x128xf32> -> vector<8x128xf32>
    %c0_3 = arith.constant 0 : index
    %c0_4 = arith.constant 0 : index
    %4 = vector.load %arg3[%c0_3, %c0_4] : memref<1x128xf32, #tpu.memory_space<vmem>>, vector<1x128xf32>
    %5 = vector.broadcast %4 : vector<1x128xf32> to vector<8x128xf32>
    %6 = arith.addf %3, %5 : vector<8x128xf32>
    %cst_5 = arith.constant 0.000000e+00 : f32
    %7 = vector.broadcast %cst_5 : f32 to vector<8x128xf32>
    %8 = arith.maximumf %6, %7 : vector<8x128xf32>
    %9 = arith.truncf %8 : vector<8x128xf32> to vector<8x128xbf16>
    %c0_6 = arith.constant 0 : index
    %c0_7 = arith.constant 0 : index
    %10 = vector.load %arg4[%c0_6, %c0_7] : memref<128x128xbf16, #tpu.memory_space<vmem>>, vector<128x128xbf16>
    %cst_8 = arith.constant dense<0.000000e+00> : vector<8x128xf32>
    %11 = tpu.matmul %9, %10, %cst_8 {dimension_numbers = #tpu.dot_dimension_numbers<[1], [0], [0], [1], [0, 0, 1, 1], [], []>} : vector<8x128xbf16>, vector<128x128xbf16>, vector<8x128xf32> -> vector<8x128xf32>
    %c0_9 = arith.constant 0 : index
    %c0_10 = arith.constant 0 : index
    %12 = vector.load %arg5[%c0_9, %c0_10] : memref<1x128xf32, #tpu.memory_space<vmem>>, vector<1x128xf32>
    %13 = vector.broadcast %12 : vector<1x128xf32> to vector<8x128xf32>
    %14 = arith.addf %11, %13 : vector<8x128xf32>
    %cst_11 = arith.constant dense<0xFF800000> : vector<8xf32>
    %15 = vector.multi_reduction <maximumf>, %14, %cst_11 [1] : vector<8x128xf32> to vector<8xf32>
    %16 = vector.shape_cast %15 : vector<8xf32> to vector<8x1xf32>
    %17 = vector.broadcast %16 : vector<8x1xf32> to vector<8x128xf32>
    %18 = arith.subf %14, %17 : vector<8x128xf32>
    %19 = math.exp %18 : vector<8x128xf32>
    %cst_12 = arith.constant dense<0.000000e+00> : vector<8xf32>
    %20 = vector.multi_reduction <add>, %19, %cst_12 [1] : vector<8x128xf32> to vector<8xf32>
    %21 = vector.shape_cast %20 : vector<8xf32> to vector<8x1xf32>
    %22 = tpu.reciprocal %21 {approx = true} : vector<8x1xf32> -> vector<8x1xf32>
    %23 = arith.mulf %21, %22 : vector<8x1xf32>
    %cst_13 = arith.constant 2.000000e+00 : f32
    %24 = vector.broadcast %cst_13 : f32 to vector<8x1xf32>
    %25 = arith.subf %24, %23 : vector<8x1xf32>
    %26 = arith.mulf %22, %25 : vector<8x1xf32>
    %27 = vector.broadcast %26 : vector<8x1xf32> to vector<8x128xf32>
    %28 = arith.mulf %19, %27 : vector<8x128xf32>
    %29 = vector.extract_strided_slice %28 {offsets = [0, 0], sizes = [8, 4], strides = [1, 1]} : vector<8x128xf32> to vector<8x4xf32>
    %c0_14 = arith.constant 0 : index
    %c0_15 = arith.constant 0 : index
    %30 = vector.load %arg6[%c0_14, %c0_15] : memref<8x4xf32, #tpu.memory_space<vmem>>, vector<8x4xf32>
    tpu.vector_store %arg6[%c0_14, %c0_15], %29 {strides = array<i32>} : memref<8x4xf32, #tpu.memory_space<vmem>>, vector<8x4xf32>,
    return
  }
  func.func @transform_0(%arg0: i32) -> (i32, i32) {
    %c0_i32 = arith.constant 0 : i32
    %c0_i32_0 = arith.constant 0 : i32
    return %arg0, %c0_i32 : i32, i32
  }
  func.func @transform_1(%arg0: i32) -> (i32, i32) {
    %c0_i32 = arith.constant 0 : i32
    %c0_i32_0 = arith.constant 0 : i32
    %c0_i32_1 = arith.constant 0 : i32
    return %c0_i32, %c0_i32_0 : i32, i32
  }
  func.func @transform_2(%arg0: i32) -> (i32, i32) {
    %c0_i32 = arith.constant 0 : i32
    %c0_i32_0 = arith.constant 0 : i32
    %c0_i32_1 = arith.constant 0 : i32
    return %c0_i32, %c0_i32_0 : i32, i32
  }
  func.func @transform_3(%arg0: i32) -> (i32, i32) {
    %c0_i32 = arith.constant 0 : i32
    %c0_i32_0 = arith.constant 0 : i32
    %c0_i32_1 = arith.constant 0 : i32
    return %c0_i32, %c0_i32_0 : i32, i32
  }
  func.func @transform_4(%arg0: i32) -> (i32, i32) {
    %c0_i32 = arith.constant 0 : i32
    %c0_i32_0 = arith.constant 0 : i32
    %c0_i32_1 = arith.constant 0 : i32
    return %c0_i32, %c0_i32_0 : i32, i32
  }
  func.func @transform_5(%arg0: i32) -> (i32, i32) {
    %c0_i32 = arith.constant 0 : i32
    %c0_i32_0 = arith.constant 0 : i32
    return %arg0, %c0_i32 : i32, i32
  }
}

module attributes {stable_mosaic.version = 11 : i64} {
  func.func @_mlp_softmax_kernel(%arg0: i32, %arg1: memref<8x16xf32, #tpu.memory_space<vmem>>, %arg2: memref<16x128xbf16, #tpu.memory_space<vmem>>, %arg3: memref<1x128xf32, #tpu.memory_space<vmem>>, %arg4: memref<128x128xbf16, #tpu.memory_space<vmem>>, %arg5: memref<1x128xf32, #tpu.memory_space<vmem>>, %arg6: memref<8x4xf32, #tpu.memory_space<vmem>>) attributes {dimension_semantics = [#tpu.dimension_semantics<parallel>], iteration_bounds = array<i64: 1>, scalar_prefetch = 0 : i64, scratch_operands = 0 : i64, tpu.core_type = #tpu.core_type<tc>, window_params = [{transform_indices = @transform_0, window_bounds = array<i64: 8, 16>}, {pipeline_mode = #tpu.pipeline_mode<synchronous>, transform_indices = @transform_1, window_bounds = array<i64: 16, 128>}, {pipeline_mode = #tpu.pipeline_mode<synchronous>, transform_indices = @transform_2, window_bounds = array<i64: 1, 128>}, {pipeline_mode = #tpu.pipeline_mode<synchronous>, transform_indices = @transform_3, window_bounds = array<i64: 128, 128>}, {pipeline_mode = #tpu.pipeline_mode<synchronous>, transform_indices = @transform_4, window_bounds = array<i64: 1, 128>}, {transform_indices = @transform_5, window_bounds = array<i64: 8, 4>}]} {
    %c0 = arith.constant 0 : index
    %c0_0 = arith.constant 0 : index
    %0 = vector.load %arg1[%c0, %c0_0] : memref<8x16xf32, #tpu.memory_space<vmem>>, vector<8x16xf32>
    %1 = arith.truncf %0 : vector<8x16xf32> to vector<8x16xbf16>
    %c0_1 = arith.constant 0 : index
    %c0_2 = arith.constant 0 : index
    %2 = vector.load %arg2[%c0_1, %c0_2] : memref<16x128xbf16, #tpu.memory_space<vmem>>, vector<16x128xbf16>
    %cst = arith.constant dense<0.000000e+00> : vector<8x128xf32>
    %3 = tpu.matmul %1, %2, %cst {dimension_numbers = #tpu.dot_dimension_numbers<[1], [0], [0], [1], [0, 0, 1, 1], [], []>} : vector<8x16xbf16>, vector<16x128xbf16>, vector<8x128xf32> -> vector<8x128xf32>
    %c0_3 = arith.constant 0 : index
    %c0_4 = arith.constant 0 : index
    %4 = vector.load %arg3[%c0_3, %c0_4] : memref<1x128xf32, #tpu.memory_space<vmem>>, vector<1x128xf32>
    %5 = vector.broadcast %4 : vector<1x128xf32> to vector<8x128xf32>
    %6 = arith.addf %3, %5 : vector<8x128xf32>
    %cst_5 = arith.constant 0.000000e+00 : f32
    %7 = vector.broadcast %cst_5 : f32 to vector<8x128xf32>
    %8 = arith.maximumf %6, %7 : vector<8x128xf32>
    %9 = arith.truncf %8 : vector<8x128xf32> to vector<8x128xbf16>
    %c0_6 = arith.constant 0 : index
    %c0_7 = arith.constant 0 : index
    %10 = vector.load %arg4[%c0_6, %c0_7] : memref<128x128xbf16, #tpu.memory_space<vmem>>, vector<128x128xbf16>
    %cst_8 = arith.constant dense<0.000000e+00> : vector<8x128xf32>
    %11 = tpu.matmul %9, %10, %cst_8 {dimension_numbers = #tpu.dot_dimension_numbers<[1], [0], [0], [1], [0, 0, 1, 1], [], []>} : vector<8x128xbf16>, vector<128x128xbf16>, vector<8x128xf32> -> vector<8x128xf32>
    %c0_9 = arith.constant 0 : index
    %c0_10 = arith.constant 0 : index
    %12 = vector.load %arg5[%c0_9, %c0_10] : memref<1x128xf32, #tpu.memory_space<vmem>>, vector<1x128xf32>
    %13 = vector.broadcast %12 : vector<1x128xf32> to vector<8x128xf32>
    %14 = arith.addf %11, %13 : vector<8x128xf32>
    %cst_11 = arith.constant dense<0xFF800000> : vector<8xf32>
    %15 = vector.multi_reduction <maximumf>, %14, %cst_11 [1] : vector<8x128xf32> to vector<8xf32>
    %16 = vector.shape_cast %15 : vector<8xf32> to vector<8x1xf32>
    %17 = vector.broadcast %16 : vector<8x1xf32> to vector<8x128xf32>
    %18 = arith.subf %14, %17 : vector<8x128xf32>
    %19 = math.exp %18 : vector<8x128xf32>
    %cst_12 = arith.constant dense<0.000000e+00> : vector<8xf32>
    %20 = vector.multi_reduction <add>, %19, %cst_12 [1] : vector<8x128xf32> to vector<8xf32>
    %21 = vector.shape_cast %20 : vector<8xf32> to vector<8x1xf32>
    %22 = tpu.reciprocal %21 {approx = true} : vector<8x1xf32> -> vector<8x1xf32>
    %23 = arith.mulf %21, %22 : vector<8x1xf32>
    %cst_13 = arith.constant 2.000000e+00 : f32
    %24 = vector.broadcast %cst_13 : f32 to vector<8x1xf32>
    %25 = arith.subf %24, %23 : vector<8x1xf32>
    %26 = arith.mulf %22, %25 : vector<8x1xf32>
    %27 = vector.broadcast %26 : vector<8x1xf32> to vector<8x128xf32>
    %28 = arith.mulf %19, %27 : vector<8x128xf32>
    %29 = vector.extract_strided_slice %28 {offsets = [0, 0], sizes = [8, 4], strides = [1, 1]} : vector<8x128xf32> to vector<8x4xf32>
    %c0_14 = arith.constant 0 : index
    %c0_15 = arith.constant 0 : index
    %30 = vector.load %arg6[%c0_14, %c0_15] : memref<8x4xf32, #tpu.memory_space<vmem>>, vector<8x4xf32>
    tpu.vector_store %arg6[%c0_14, %c0_15], %29 {strides = array<i32>} : memref<8x4xf32, #tpu.memory_space<vmem>>, vector<8x4xf32>,
    return
  }
  func.func @transform_0(%arg0: i32) -> (i32, i32) {
    %c0_i32 = arith.constant 0 : i32
    %c0_i32_0 = arith.constant 0 : i32
    return %arg0, %c0_i32 : i32, i32
  }
  func.func @transform_1(%arg0: i32) -> (i32, i32) {
    %c0_i32 = arith.constant 0 : i32
    %c0_i32_0 = arith.constant 0 : i32
    %c0_i32_1 = arith.constant 0 : i32
    return %c0_i32, %c0_i32_0 : i32, i32
  }
  func.func @transform_2(%arg0: i32) -> (i32, i32) {
    %c0_i32 = arith.constant 0 : i32
    %c0_i32_0 = arith.constant 0 : i32
    %c0_i32_1 = arith.constant 0 : i32
    return %c0_i32, %c0_i32_0 : i32, i32
  }
  func.func @transform_3(%arg0: i32) -> (i32, i32) {
    %c0_i32 = arith.constant 0 : i32
    %c0_i32_0 = arith.constant 0 : i32
    %c0_i32_1 = arith.constant 0 : i32
    return %c0_i32, %c0_i32_0 : i32, i32
  }
  func.func @transform_4(%arg0: i32) -> (i32, i32) {
    %c0_i32 = arith.constant 0 : i32
    %c0_i32_0 = arith.constant 0 : i32
    %c0_i32_1 = arith.constant 0 : i32
    return %c0_i32, %c0_i32_0 : i32, i32
  }
  func.func @transform_5(%arg0: i32) -> (i32, i32) {
    %c0_i32 = arith.constant 0 : i32
    %c0_i32_0 = arith.constant 0 : i32
    return %arg0, %c0_i32 : i32, i32
  }
}

</mosaic_0001>

<bundles_post_ra>
// kernel: tpu_custom_call.1
= control target key start
LH: loop header
LB: loop body
LE: loop exit
PB: predicated region body
PF: predicated region fallthrough
CT: control target
= control target key end

     0   :  { %10 = vsyncpa [#allocation3], 0  ;;  %s481_s0 = inlined_call_operand.hbm [shape: f32[8,16], index: 0, kind: input, shape index: {}]   ;;  %s482_s1 = inlined_call_operand.hbm [shape: bf16[16,128], index: 1, kind: input, shape index: {}]   ;;  %s483_s2 = inlined_call_operand.vmem [shape: f32[1,128], index: 2, kind: input, shape index: {}]   ;;  %s484_s3 = inlined_call_operand.hbm [shape: bf16[128,128], index: 3, kind: input, shape index: {}]   ;;  %s485_s4 = inlined_call_operand.vmem [shape: f32[1,128], index: 4, kind: input, shape index: {}]   ;;  %s486_s5 = inlined_call_operand.vmem [shape: f32[8,4], index: 5, kind: output, shape index: {}]  }
   0x1   :  { %11 = vsyncpa [#allocation5], 0  ;;  %s393_s18 = smov [#allocation4]   ;;  %s323_s22 = scalar_lea.hbm %s482_s1, 128 }
   0x2   :  { %s27_s19 = sshll.u32 %s393_s18, 4  ;;  %p324_p0 = scmp.ne.s32.totalorder %s482_s1, %s323_s22  ;;  %s28_s19 = int_to_ptr.vmem [resolvable:$true] %s27_s19 }
   0x3   :  { %p327_p1 = scmp.lt.u32.totalorder %s323_s22, %s482_s1 }
   0x5   :  { %p329_p2 = pnand %p327_p1, %p324_p0 }
   0x7   :  { %332 = shalt.err (!%p329_p2)
}
   0x8   :  { %s333_s27 = scalar_lea.vmem %s28_s19, 128  ;;  %p338_p4 = scmp.lt.s32.totalorder %s28_s19, %s28_s19 }
   0x9   :  { %p334_p3 = scmp.ne.s32.totalorder %s28_s19, %s333_s27  ;;  %p339_p5 = scmp.lt.s32.totalorder %s333_s27, %s333_s27 }
   0xb   :  { %p340_p6 = por %p339_p5, %p338_p4 }
   0xd   :  { %p341_p7 = pnand %p340_p6, %p334_p3 }
   0xf   :  { %344 = shalt.err (!%p341_p7)
}
  0x10   :  { %s394_s28 = smov 64   ;;  %s395_s29 = smov 4  }
  0x11   :  { %33 = dma.hbm_to_vmem [thread:$0]  %s482_s1, 128, %s28_s19, [#allocation5], %s394_s28, %s394_s28, %s395_s29  }
  0x12   :  { %s396_s7 = smov [#allocation2]   ;;  %s397_s9 = smov [#allocation6]  }
  0x13   :  { %s18_s8 = sshll.u32 %s396_s7, 4  ;;  %s41_s10 = sshll.u32 %s397_s9, 4  ;;  %s19_s8 = int_to_ptr.vmem [resolvable:$true] %s18_s8  ;;  %s42_s10 = int_to_ptr.vmem [resolvable:$true] %s41_s10 }
  0x14   :  { %s345_s13 = scalar_lea.hbm %s481_s0, 128 }
  0x15   :  { %p346_p8 = scmp.ne.s32.totalorder %s481_s0, %s345_s13  ;;  %p349_p9 = scmp.lt.u32.totalorder %s345_s13, %s481_s0 }
  0x17   :  { %p351_p10 = pnand %p349_p9, %p346_p8 }
  0x19   :  { %354 = shalt.err (!%p351_p10)
}
  0x1a   :  { %s355_s1 = scalar_lea.vmem %s19_s8, 128  ;;  %p360_p12 = scmp.lt.s32.totalorder %s19_s8, %s19_s8 }
  0x1b   :  { %p356_p11 = scmp.ne.s32.totalorder %s19_s8, %s355_s1  ;;  %p361_p13 = scmp.lt.s32.totalorder %s355_s1, %s355_s1 }
  0x1d   :  { %p362_p0 = por %p361_p13, %p360_p12 }
  0x1f   :  { %p363_p1 = pnand %p362_p0, %p356_p11 }
  0x21   :  { %366 = shalt.err (!%p363_p1)
}
  0x22   :  { %21 = dma.hbm_to_vmem [thread:$0]  %s481_s0, 128, %s19_s8, [#allocation3]  }
  0x23   :  { %s367_s22 = scalar_lea.hbm %s484_s3, 1024 }
  0x24   :  { %p368_p2 = scmp.ne.s32.totalorder %s484_s3, %s367_s22  ;;  %p371_p3 = scmp.lt.u32.totalorder %s367_s22, %s484_s3 }
  0x26   :  { %p373_p4 = pnand %p371_p3, %p368_p2 }
  0x28   :  { %376 = shalt.err (!%p373_p4)
}
  0x29   :  { %s377_s27 = scalar_lea.vmem %s42_s10, 1024  ;;  %p382_p6 = scmp.lt.s32.totalorder %s42_s10, %s42_s10 }
  0x2a   :  { %p378_p5 = scmp.ne.s32.totalorder %s42_s10, %s377_s27  ;;  %p383_p7 = scmp.lt.s32.totalorder %s377_s27, %s377_s27 }
  0x2c   :  { %p384_p8 = por %p383_p7, %p382_p6 }
  0x2e   :  { %p385_p9 = pnand %p384_p8, %p378_p5 }
  0x30   :  { %388 = shalt.err (!%p385_p9)
}
  0x31   :  { %47 = dma.hbm_to_vmem [thread:$0]  %s484_s3, 1024, %s42_s10, [#allocation5], %s394_s28, %s394_s28, %s395_s29  }
  0x32   :  { %389 = dma.done.wait [#allocation3], 128  }
  0x33   :  { %390 = vsyncadd [#allocation3], 4294967168 }
  0x34   :  { %391 = dma.done.wait [#allocation5], 1152  }
  0x35   :  { %392 = vsyncadd [#allocation5], 4294966144  ;;  %v398_v0 = vmov 0.0   ;;  %vm399_vm0 = vmmov 0   ;;  %v310_v1 = vld [vmem:[#allocation4] sm:$0xff]   ;;  %v60_v2 = vld [vmem:[#allocation2] sm:$0xff] }
  0x36   :  { %277 = vmatprep.subr.bf16.mxu0 %v398_v0  ;;  %279 = vmatprep.mubr.msk.bf16.mxu0 %vm399_vm0, %v398_v0  ;;  %v61_v3 = vpack.c.bf16 %v60_v2, %v60_v2  ;;  %vm77_vm1 = vcmask 130048   ;;  %v311_v4 = vld [vmem:[#allocation6] sm:$0xff]   ;;  %v312_v5 = vld [vmem:[#allocation6 + $0x8] sm:$0xff]   ;;  %v313_v6 = vld [vmem:[#allocation6 + $0x10] sm:$0xff]   ;;  %vm246_vm2 = vcmask 31744  }
  0x37   :  { %283 = vmatprep.subr.bf16.mxu1 %v398_v0  ;;  %299 = vmatprep.mubr.msk.bf16.mxu1 %vm399_vm0, %v398_v0  ;;  %v314_v7 = vld [vmem:[#allocation6 + $0x18] sm:$0xff]   ;;  %v315_v8 = vld [vmem:[#allocation6 + $0x20] sm:$0xff]   ;;  %v316_v9 = vld [vmem:[#allocation6 + $0x28] sm:$0xff]  }
  0x38   :  { %278 = vmatpush3.bf16.msra.mxu0 %v310_v1  ;;  %284 = vmatpush3.bf16.msra.mxu1 %v311_v4  ;;  %v317_v10 = vld [vmem:[#allocation6 + $0x30] sm:$0xff]   ;;  %v318_v11 = vld [vmem:[#allocation6 + $0x38] sm:$0xff]  }
  0x39   :  { %285 = vmatprep.subr.bf16.mxu1 %v398_v0  ;;  %v254_v12 = vld [vmem:[%s483_s2] ss:$0 sm:$0xff] }
  0x3a   :  { %v257_v20 = vld [vmem:[%s485_s4] ss:$0 sm:$0xff] }
  0x3b   :  { %280 = vmatmul.mubr.msk.bf16.vlgmr.msra.gmra.mrb[0].mxu0 %vm77_vm1, %v61_v3 }
  0x3c   :  { %286 = vmatpush3.bf16.msra.mxu1 %v312_v5 }
  0x3d   :  { %287 = vmatprep.subr.bf16.mxu1 %v398_v0 }
  0x40   :  { %288 = vmatpush3.bf16.msra.mxu1 %v313_v6 }
  0x41   :  { %289 = vmatprep.subr.bf16.mxu1 %v398_v0 }
  0x44   :  { %290 = vmatpush3.bf16.msra.mxu1 %v314_v7 }
  0x45   :  { %291 = vmatprep.subr.bf16.mxu1 %v398_v0 }
  0x48   :  { %292 = vmatpush3.bf16.msra.mxu1 %v315_v8 }
  0x49   :  { %293 = vmatprep.subr.bf16.mxu1 %v398_v0 }
  0x4c   :  { %294 = vmatpush3.bf16.msra.mxu1 %v316_v9 }
  0x4d   :  { %295 = vmatprep.subr.bf16.mxu1 %v398_v0 }
  0x50   :  { %296 = vmatpush3.bf16.msra.mxu1 %v317_v10 }
  0x51   :  { %297 = vmatprep.subr.bf16.mxu1 %v398_v0 }
  0x54   :  { %298 = vmatpush3.bf16.msra.mxu1 %v318_v11 }
 0x10e   :  { %v115_v13 = vpop.f32.mrb[0].mxu0 }
 0x10f   :  { %v116_v14 = vadd.f32 %v254_v12, %v115_v13  ;;  %v281_v15 = vpop.f32.mrb[1].mxu0 }
 0x110   :  { %v118_v16 = vpop.f32.mrb[2].mxu0 }
 0x111   :  { %v121_v17 = vmax.f32 %v116_v14, 0.0  ;;  %v282_v18 = vpop.f32.mrb[3].mxu0 }
 0x113   :  { %v122_v19 = vpack.c.bf16 %v121_v17, %v121_v17 }
 0x115   :  { %300 = vmatmul.mubr.bf16.vlgmr.msra.gmra.mrb[0].mxu1 %v122_v19 }
 0x1e8   :  { %v228_v21 = vpop.f32.mrb[0].mxu1 }
 0x1e9   :  { %v229_v22 = vadd.f32 %v257_v20, %v228_v21  ;;  %v301_v23 = vpop.f32.mrb[1].mxu1 }
 0x1ea   :  { %v231_v24 = vpop.f32.mrb[2].mxu1 }
 0x1eb   :  { %234 = vmax.xlane.f32.xlu0 %v229_v22  ;;  %v302_v25 = vpop.f32.mrb[3].mxu1 }
 0x278   :  { %v235_v26 = vpop.xlane.xlu0 %234 }
 0x279   :  { %v236_v27 = vsub.f32 %v229_v22, %v235_v26 }
 0x27b   :  { %v237_v28 = vmul.f32 1.442695, %v236_v27 }
 0x27d   :  { %319 = vpow2.f32 %v237_v28 }
 0x287   :  { %v320_v29 = vpop.eup %319 }
 0x288   :  { %239 = vadd.xlane.f32.xlu0 %v320_v29 }
 0x315   :  { %v240_v30 = vpop.xlane.xlu0 %239 }
 0x316   :  { %321 = vrcp.f32 %v240_v30 }
 0x320   :  { %v322_v31 = vpop.eup %321 }
 0x321   :  { %v242_v32 = vmul.f32 %v322_v31, %v240_v30 }
 0x323   :  { %v243_v33 = vsub.f32 2.0, %v242_v32 }
 0x325   :  { %v244_v34 = vmul.f32 %v322_v31, %v243_v33 }
 0x327   :  { %v245_v35 = vmul.f32 %v320_v29, %v244_v34 }
 0x329   :  { %247 = vst.msk [vmem:[%s486_s5] sm:$0xff] %vm246_vm2, %v245_v35 }
 0x32a   :  { %252 = vsyncpa [#allocation3], 1 }
 0x32b   :  { %253 = vsyncpa [#allocation5], 1 }

// kernel: tpu_custom_call.1
= control target key start
LH: loop header
LB: loop body
LE: loop exit
PB: predicated region body
PF: predicated region fallthrough
CT: control target
= control target key end

     0   :  { %10 = vsyncpa [#allocation3], 0  ;;  %s481_s0 = inlined_call_operand.hbm [shape: f32[8,16], index: 0, kind: input, shape index: {}]   ;;  %s482_s1 = inlined_call_operand.hbm [shape: bf16[16,128], index: 1, kind: input, shape index: {}]   ;;  %s483_s2 = inlined_call_operand.vmem [shape: f32[1,128], index: 2, kind: input, shape index: {}]   ;;  %s484_s3 = inlined_call_operand.hbm [shape: bf16[128,128], index: 3, kind: input, shape index: {}]   ;;  %s485_s4 = inlined_call_operand.vmem [shape: f32[1,128], index: 4, kind: input, shape index: {}]   ;;  %s486_s5 = inlined_call_operand.vmem [shape: f32[8,4], index: 5, kind: output, shape index: {}]  }
   0x1   :  { %11 = vsyncpa [#allocation5], 0  ;;  %s393_s18 = smov [#allocation4]   ;;  %s323_s22 = scalar_lea.hbm %s482_s1, 128 }
   0x2   :  { %s27_s19 = sshll.u32 %s393_s18, 4  ;;  %p324_p0 = scmp.ne.s32.totalorder %s482_s1, %s323_s22  ;;  %s28_s19 = int_to_ptr.vmem [resolvable:$true] %s27_s19 }
   0x3   :  { %p327_p1 = scmp.lt.u32.totalorder %s323_s22, %s482_s1 }
   0x5   :  { %p329_p2 = pnand %p327_p1, %p324_p0 }
   0x7   :  { %332 = shalt.err (!%p329_p2)
}
   0x8   :  { %s333_s27 = scalar_lea.vmem %s28_s19, 128  ;;  %p338_p4 = scmp.lt.s32.totalorder %s28_s19, %s28_s19 }
   0x9   :  { %p334_p3 = scmp.ne.s32.totalorder %s28_s19, %s333_s27  ;;  %p339_p5 = scmp.lt.s32.totalorder %s333_s27, %s333_s27 }
   0xb   :  { %p340_p6 = por %p339_p5, %p338_p4 }
   0xd   :  { %p341_p7 = pnand %p340_p6, %p334_p3 }
   0xf   :  { %344 = shalt.err (!%p341_p7)
}
  0x10   :  { %s394_s28 = smov 64   ;;  %s395_s29 = smov 4  }
  0x11   :  { %33 = dma.hbm_to_vmem [thread:$0]  %s482_s1, 128, %s28_s19, [#allocation5], %s394_s28, %s394_s28, %s395_s29  }
  0x12   :  { %s396_s7 = smov [#allocation2]   ;;  %s397_s9 = smov [#allocation6]  }
  0x13   :  { %s18_s8 = sshll.u32 %s396_s7, 4  ;;  %s41_s10 = sshll.u32 %s397_s9, 4  ;;  %s19_s8 = int_to_ptr.vmem [resolvable:$true] %s18_s8  ;;  %s42_s10 = int_to_ptr.vmem [resolvable:$true] %s41_s10 }
  0x14   :  { %s345_s13 = scalar_lea.hbm %s481_s0, 128 }
  0x15   :  { %p346_p8 = scmp.ne.s32.totalorder %s481_s0, %s345_s13  ;;  %p349_p9 = scmp.lt.u32.totalorder %s345_s13, %s481_s0 }
  0x17   :  { %p351_p10 = pnand %p349_p9, %p346_p8 }
  0x19   :  { %354 = shalt.err (!%p351_p10)
}
  0x1a   :  { %s355_s1 = scalar_lea.vmem %s19_s8, 128  ;;  %p360_p12 = scmp.lt.s32.totalorder %s19_s8, %s19_s8 }
  0x1b   :  { %p356_p11 = scmp.ne.s32.totalorder %s19_s8, %s355_s1  ;;  %p361_p13 = scmp.lt.s32.totalorder %s355_s1, %s355_s1 }
  0x1d   :  { %p362_p0 = por %p361_p13, %p360_p12 }
  0x1f   :  { %p363_p1 = pnand %p362_p0, %p356_p11 }
  0x21   :  { %366 = shalt.err (!%p363_p1)
}
  0x22   :  { %21 = dma.hbm_to_vmem [thread:$0]  %s481_s0, 128, %s19_s8, [#allocation3]  }
  0x23   :  { %s367_s22 = scalar_lea.hbm %s484_s3, 1024 }
  0x24   :  { %p368_p2 = scmp.ne.s32.totalorder %s484_s3, %s367_s22  ;;  %p371_p3 = scmp.lt.u32.totalorder %s367_s22, %s484_s3 }
  0x26   :  { %p373_p4 = pnand %p371_p3, %p368_p2 }
  0x28   :  { %376 = shalt.err (!%p373_p4)
}
  0x29   :  { %s377_s27 = scalar_lea.vmem %s42_s10, 1024  ;;  %p382_p6 = scmp.lt.s32.totalorder %s42_s10, %s42_s10 }
  0x2a   :  { %p378_p5 = scmp.ne.s32.totalorder %s42_s10, %s377_s27  ;;  %p383_p7 = scmp.lt.s32.totalorder %s377_s27, %s377_s27 }
  0x2c   :  { %p384_p8 = por %p383_p7, %p382_p6 }
  0x2e   :  { %p385_p9 = pnand %p384_p8, %p378_p5 }
  0x30   :  { %388 = shalt.err (!%p385_p9)
}
  0x31   :  { %47 = dma.hbm_to_vmem [thread:$0]  %s484_s3, 1024, %s42_s10, [#allocation5], %s394_s28, %s394_s28, %s395_s29  }
  0x32   :  { %389 = dma.done.wait [#allocation3], 128  }
  0x33   :  { %390 = vsyncadd [#allocation3], 4294967168 }
  0x34   :  { %391 = dma.done.wait [#allocation5], 1152  }
  0x35   :  { %392 = vsyncadd [#allocation5], 4294966144  ;;  %v398_v0 = vmov 0.0   ;;  %vm399_vm0 = vmmov 0   ;;  %v310_v1 = vld [vmem:[#allocation4] sm:$0xff]   ;;  %v60_v2 = vld [vmem:[#allocation2] sm:$0xff] }
  0x36   :  { %277 = vmatprep.subr.bf16.mxu0 %v398_v0  ;;  %279 = vmatprep.mubr.msk.bf16.mxu0 %vm399_vm0, %v398_v0  ;;  %v61_v3 = vpack.c.bf16 %v60_v2, %v60_v2  ;;  %vm77_vm1 = vcmask 130048   ;;  %v311_v4 = vld [vmem:[#allocation6] sm:$0xff]   ;;  %v312_v5 = vld [vmem:[#allocation6 + $0x8] sm:$0xff]   ;;  %v313_v6 = vld [vmem:[#allocation6 + $0x10] sm:$0xff]   ;;  %vm246_vm2 = vcmask 31744  }
  0x37   :  { %283 = vmatprep.subr.bf16.mxu1 %v398_v0  ;;  %299 = vmatprep.mubr.msk.bf16.mxu1 %vm399_vm0, %v398_v0  ;;  %v314_v7 = vld [vmem:[#allocation6 + $0x18] sm:$0xff]   ;;  %v315_v8 = vld [vmem:[#allocation6 + $0x20] sm:$0xff]   ;;  %v316_v9 = vld [vmem:[#allocation6 + $0x28] sm:$0xff]  }
  0x38   :  { %278 = vmatpush3.bf16.msra.mxu0 %v310_v1  ;;  %284 = vmatpush3.bf16.msra.mxu1 %v311_v4  ;;  %v317_v10 = vld [vmem:[#allocation6 + $0x30] sm:$0xff]   ;;  %v318_v11 = vld [vmem:[#allocation6 + $0x38] sm:$0xff]  }
  0x39   :  { %285 = vmatprep.subr.bf16.mxu1 %v398_v0  ;;  %v254_v12 = vld [vmem:[%s483_s2] ss:$0 sm:$0xff] }
  0x3a   :  { %v257_v20 = vld [vmem:[%s485_s4] ss:$0 sm:$0xff] }
  0x3b   :  { %280 = vmatmul.mubr.msk.bf16.vlgmr.msra.gmra.mrb[0].mxu0 %vm77_vm1, %v61_v3 }
  0x3c   :  { %286 = vmatpush3.bf16.msra.mxu1 %v312_v5 }
  0x3d   :  { %287 = vmatprep.subr.bf16.mxu1 %v398_v0 }
  0x40   :  { %288 = vmatpush3.bf16.msra.mxu1 %v313_v6 }
  0x41   :  { %289 = vmatprep.subr.bf16.mxu1 %v398_v0 }
  0x44   :  { %290 = vmatpush3.bf16.msra.mxu1 %v314_v7 }
  0x45   :  { %291 = vmatprep.subr.bf16.mxu1 %v398_v0 }
  0x48   :  { %292 = vmatpush3.bf16.msra.mxu1 %v315_v8 }
  0x49   :  { %293 = vmatprep.subr.bf16.mxu1 %v398_v0 }
  0x4c   :  { %294 = vmatpush3.bf16.msra.mxu1 %v316_v9 }
  0x4d   :  { %295 = vmatprep.subr.bf16.mxu1 %v398_v0 }
  0x50   :  { %296 = vmatpush3.bf16.msra.mxu1 %v317_v10 }
  0x51   :  { %297 = vmatprep.subr.bf16.mxu1 %v398_v0 }
  0x54   :  { %298 = vmatpush3.bf16.msra.mxu1 %v318_v11 }
 0x10e   :  { %v115_v13 = vpop.f32.mrb[0].mxu0 }
 0x10f   :  { %v116_v14 = vadd.f32 %v254_v12, %v115_v13  ;;  %v281_v15 = vpop.f32.mrb[1].mxu0 }
 0x110   :  { %v118_v16 = vpop.f32.mrb[2].mxu0 }
 0x111   :  { %v121_v17 = vmax.f32 %v116_v14, 0.0  ;;  %v282_v18 = vpop.f32.mrb[3].mxu0 }
 0x113   :  { %v122_v19 = vpack.c.bf16 %v121_v17, %v121_v17 }
 0x115   :  { %300 = vmatmul.mubr.bf16.vlgmr.msra.gmra.mrb[0].mxu1 %v122_v19 }
 0x1e8   :  { %v228_v21 = vpop.f32.mrb[0].mxu1 }
 0x1e9   :  { %v229_v22 = vadd.f32 %v257_v20, %v228_v21  ;;  %v301_v23 = vpop.f32.mrb[1].mxu1 }
 0x1ea   :  { %v231_v24 = vpop.f32.mrb[2].mxu1 }
 0x1eb   :  { %234 = vmax.xlane.f32.xlu0 %v229_v22  ;;  %v302_v25 = vpop.f32.mrb[3].mxu1 }
 0x278   :  { %v235_v26 = vpop.xlane.xlu0 %234 }
 0x279   :  { %v236_v27 = vsub.f32 %v229_v22, %v235_v26 }
 0x27b   :  { %v237_v28 = vmul.f32 1.442695, %v236_v27 }
 0x27d   :  { %319 = vpow2.f32 %v237_v28 }
 0x287   :  { %v320_v29 = vpop.eup %319 }
 0x288   :  { %239 = vadd.xlane.f32.xlu0 %v320_v29 }
 0x315   :  { %v240_v30 = vpop.xlane.xlu0 %239 }
 0x316   :  { %321 = vrcp.f32 %v240_v30 }
 0x320   :  { %v322_v31 = vpop.eup %321 }
 0x321   :  { %v242_v32 = vmul.f32 %v322_v31, %v240_v30 }
 0x323   :  { %v243_v33 = vsub.f32 2.0, %v242_v32 }
 0x325   :  { %v244_v34 = vmul.f32 %v322_v31, %v243_v33 }
 0x327   :  { %v245_v35 = vmul.f32 %v320_v29, %v244_v34 }
 0x329   :  { %247 = vst.msk [vmem:[%s486_s5] sm:$0xff] %vm246_vm2, %v245_v35 }
 0x32a   :  { %252 = vsyncpa [#allocation3], 1 }
 0x32b   :  { %253 = vsyncpa [#allocation5], 1 }

</bundles_post_ra>
